<compile_context>
chip_gen: v5e
topology: v5e:2x2
jax: 0.10.0
libtpu: 0.0.40
codegen_flags: <defaults>
</compile_context>

<pallas_src>
import jax
import jax.numpy as jnp
from jax.experimental import pallas as pl
from jax.experimental.pallas import tpu as pltpu


# ----------------------------- kernel -------------------------------------- #

def _edge_cls_kernel(x_ref, w1_ref, b1_ref, w2_ref, cb2_ref, out_ref):
    # x_ref   : (T, P*F)   P original rows packed per 128-lane row
    # w1_ref  : (P*F, P*H) block-diagonal Linear(F, H) weights
    # b1_ref  : (1, P*H)   Linear(F, H) bias, tiled P times
    # w2_ref  : (P*H, P)   block-diagonal Linear(H, 1) weights (segmented reduce)
    # cb2_ref : (1,)       final bias, SMEM scalar
    # out_ref : (T, P)     outputs already in original row order
    x = x_ref[...]
    h = jnp.dot(x, w1_ref[...], preferred_element_type=jnp.float32) + b1_ref[...]
    # ELU(alpha=1); exp(min(h,0)) keeps the unselected branch finite for large h.
    c = jnp.where(h > 0.0, h, jnp.exp(jnp.minimum(h, 0.0)) - 1.0)
    out = jnp.dot(c, w2_ref[...], preferred_element_type=jnp.float32) + cb2_ref[0]
    out_ref[...] = out


# --------------------------- host-side helpers ------------------------------ #

def _choose_pack(n, f, h):
    """Rows packed per 128-lane group: largest P <= 128//max(F,H) dividing N."""
    p_max = min(max(1, 128 // max(f, h)), max(1, n))
    for p in range(p_max, 0, -1):
        if n % p == 0:
            return p
    return 1


_VMEM_BUDGET = 6 << 20   # conservative: v5e default-scoped VMEM is 16 MiB


def _choose_tile_rows(np_rows, pf, ph, p):
    # Per packed row (f32): x (double-buffered) + h/c slab + out row.
    bytes_per_row = 4 * (2 * pf + 2 * ph + p)
    cap = max(8, min(8192, (_VMEM_BUDGET // bytes_per_row) // 8 * 8))
    # Single grid step when everything fits one tile (optimal on v5e/v6e; for
    # very large N the cdiv grid gives >=2 "parallel" steps so both v7x TCs work).
    return np_rows if np_rows <= cap else cap


def _pack_params(params, f, h, p, dtype=jnp.float32):
    cw1 = params["cw1"].astype(dtype)      # (F, H)
    cb1 = params["cb1"].astype(dtype)      # (1, H)
    cw2 = params["cw2"].astype(dtype)      # (H, 1)
    cb2 = params["cb2"].astype(dtype)      # (1, 1)

    w1p = jnp.zeros((p * f, p * h), dtype)
    w2p = jnp.zeros((p * h, p), dtype)
    for g in range(p):
        w1p = w1p.at[g * f:(g + 1) * f, g * h:(g + 1) * h].set(cw1)
        w2p = w2p.at[g * h:(g + 1) * h, g].set(cw2[:, 0])
    b1p = jnp.tile(cb1, (1, p))            # (1, P*H)
    return w1p, b1p, w2p, cb2.reshape((1,))


# ------------------------------ wrapper ------------------------------------- #

def edge_attention_classifier(x, params, *, tile_rows=None):
    """Forward pass of EdgeAttentionClassifier.

    x: (N, F) float32 with F = 2*node_features_dim + edge_in_channels.
    Returns (N,) — identical to the PyTorch module's `.squeeze()` output.
    The attention branch is folded away because Softmax over its size-1 axis
    is exactly 1.0, so the module output equals classifier(x) bit-for-bit.
    """
    n, f = x.shape
    hdim = params["cw1"].shape[1]

    p = _choose_pack(n, f, hdim)
    np_rows, pf, ph = n // p, p * f, p * hdim

    # Free re-view of contiguous rows (no data movement, no jnp.pad copy).
    xp = x.reshape(np_rows, pf)

    w1p, b1p, w2p, cb2 = _pack_params(params, f, hdim, p, x.dtype)

    if tile_rows is None:
        tile_rows = _choose_tile_rows(np_rows, pf, ph, p)
    assert tile_rows == np_rows or tile_rows % 8 == 0, \
        "tile_rows must be a multiple of 8 (or cover all rows)"

    grid = int(pl.cdiv(np_rows, tile_rows))
    out_rows = grid * tile_rows            # output stays in-bounds; tail sliced off

    out = pl.pallas_call(
        _edge_cls_kernel,
        out_shape=jax.ShapeDtypeStruct((out_rows, p), jnp.float32),
        grid_spec=pltpu.PrefetchScalarGridSpec(
            num_scalar_prefetch=0,
            grid=(grid,),
            in_specs=[
                pl.BlockSpec((tile_rows, pf), lambda i: (i, 0)),   # packed x rows
                pl.BlockSpec((pf, ph), lambda i: (0, 0)),          # grid-invariant weights
                pl.BlockSpec((1, ph), lambda i: (0, 0)),
                pl.BlockSpec((ph, p), lambda i: (0, 0)),
                pl.BlockSpec(memory_space=pltpu.MemorySpace.SMEM),  # (1,) scalar bias
            ],
            out_specs=pl.BlockSpec((tile_rows, p), lambda i: (i, 0)),
        ),
        compiler_params=pltpu.CompilerParams(
            dimension_semantics=("parallel",)),
    )(xp, w1p, b1p, w2p, cb2)

    return out.reshape(-1)[:n]             # == .squeeze() of the (N, 1) output


# ----------------------- reference & demo ----------------------------------- #

def init_params(key, node_features_dim, edge_in_channels, hidden_dim):
    f = 2 * node_features_dim + edge_in_channels
    ks = jax.random.split(key, 8)
    s = lambda fan_in: 1.0 / jnp.sqrt(jnp.float32(fan_in))
    return {
        # attention head: Linear(F,64), Linear(64,1)  (stored (in, out))
        "aw1": jax.random.normal(ks[0], (f, 64), jnp.float32) * s(f),
        "ab1": jax.random.normal(ks[1], (1, 64), jnp.float32) * s(f),
        "aw2": jax.random.normal(ks[2], (64, 1), jnp.float32) * s(64),
        "ab2": jax.random.normal(ks[3], (1, 1), jnp.float32) * s(64),
        # classifier: Linear(F,H), Linear(H,1)
        "cw1": jax.random.normal(ks[4], (f, hidden_dim), jnp.float32) * s(f),
        "cb1": jax.random.normal(ks[5], (1, hidden_dim), jnp.float32) * s(f),
        "cw2": jax.random.normal(ks[6], (hidden_dim, 1), jnp.float32) * s(hidden_dim),
        "cb2": jax.random.normal(ks[7], (1, 1), jnp.float32) * s(hidden_dim),
    }


def _reference(x, p):
    """Full module forward (attention path included) in plain JAX."""
    hp = jax.lax.Precision.HIGHEST
    a = jnp.maximum(jnp.dot(x, p["aw1"], precision=hp) + p["ab1"], 0.0)
    logits = jnp.dot(a, p["aw2"], precision=hp) + p["ab2"]
    attn = jax.nn.softmax(logits, axis=-1)          # size-1 axis -> exactly 1.0
    w = x * attn
    c = jnp.dot(w, p["cw1"], precision=hp) + p["cb1"]
    c = jnp.where(c > 0.0, c, jnp.exp(c) - 1.0)     # ELU(alpha=1)
    return (jnp.dot(c, p["cw2"], precision=hp) + p["cb2"])[:, 0]


if __name__ == "__main__":
    node_features_dim = 14
    edge_in_channels = 4
    hidden_dim = 32
    F = 2 * node_features_dim + edge_in_channels    # 32
    N = 200                                         # small; exercises pack factor 4

    key = jax.random.PRNGKey(0)
    k_x, k_p = jax.random.split(key)
    x = jax.random.normal(k_x, (N, F), jnp.float32)
    params = init_params(k_p, node_features_dim, edge_in_channels, hidden_dim)

    ref = _reference(x, params)

    # Single-tile path (auto tile size).
    out = jax.block_until_ready(edge_attention_classifier(x, params))
    assert out.shape == (N,)
    assert jnp.allclose(out, ref, atol=1e-4, rtol=1e-4), "mismatch vs reference"

    # Multi-step grid with a ragged tail block (50 packed rows, tile of 16).
    out2 = jax.block_until_ready(edge_attention_classifier(x, params, tile_rows=16))
    assert out2.shape == (N,)
    assert jnp.allclose(out2, ref, atol=1e-4, rtol=1e-4), "mismatch vs reference (tiled)"

    print("KERNEL_OK")
</pallas_src>

<mosaic_0001>
module attributes {stable_mosaic.version = 11 : i64} {
  func.func @_edge_cls_kernel(%arg0: i32, %arg1: memref<50x128xf32, #tpu.memory_space<vmem>>, %arg2: memref<128x128xf32, #tpu.memory_space<vmem>>, %arg3: memref<1x128xf32, #tpu.memory_space<vmem>>, %arg4: memref<128x4xf32, #tpu.memory_space<vmem>>, %arg5: memref<1xf32, #tpu.memory_space<smem>>, %arg6: memref<50x4xf32, #tpu.memory_space<vmem>>) attributes {dimension_semantics = [#tpu.dimension_semantics<parallel>], iteration_bounds = array<i64: 1>, scalar_prefetch = 0 : i64, scratch_operands = 0 : i64, tpu.core_type = #tpu.core_type<tc>, window_params = [{transform_indices = @transform_0, window_bounds = array<i64: 50, 128>}, {pipeline_mode = #tpu.pipeline_mode<synchronous>, transform_indices = @transform_1, window_bounds = array<i64: 128, 128>}, {pipeline_mode = #tpu.pipeline_mode<synchronous>, transform_indices = @transform_2, window_bounds = array<i64: 1, 128>}, {pipeline_mode = #tpu.pipeline_mode<synchronous>, transform_indices = @transform_3, window_bounds = array<i64: 128, 4>}, {transform_indices = @transform_4, window_bounds = array<i64: 1>}, {transform_indices = @transform_5, window_bounds = array<i64: 50, 4>}]} {
    %c0 = arith.constant 0 : index
    %c0_0 = arith.constant 0 : index
    %0 = vector.load %arg1[%c0, %c0_0] : memref<50x128xf32, #tpu.memory_space<vmem>>, vector<50x128xf32>
    %c0_1 = arith.constant 0 : index
    %c0_2 = arith.constant 0 : index
    %1 = vector.load %arg2[%c0_1, %c0_2] : memref<128x128xf32, #tpu.memory_space<vmem>>, vector<128x128xf32>
    %cst = arith.constant dense<0.000000e+00> : vector<50x128xf32>
    %2 = tpu.matmul %0, %1, %cst {dimension_numbers = #tpu.dot_dimension_numbers<[1], [0], [0], [1], [0, 0, 1, 1], [], []>} : vector<50x128xf32>, vector<128x128xf32>, vector<50x128xf32> -> vector<50x128xf32>
    %c0_3 = arith.constant 0 : index
    %c0_4 = arith.constant 0 : index
    %3 = vector.load %arg3[%c0_3, %c0_4] : memref<1x128xf32, #tpu.memory_space<vmem>>, vector<1x128xf32>
    %4 = vector.broadcast %3 : vector<1x128xf32> to vector<50x128xf32>
    %5 = arith.addf %2, %4 : vector<50x128xf32>
    %cst_5 = arith.constant 0.000000e+00 : f32
    %6 = vector.broadcast %cst_5 : f32 to vector<50x128xf32>
    %7 = arith.cmpf ogt, %5, %6 : vector<50x128xf32>
    %cst_6 = arith.constant 0.000000e+00 : f32
    %8 = vector.broadcast %cst_6 : f32 to vector<50x128xf32>
    %9 = arith.minimumf %5, %8 : vector<50x128xf32>
    %10 = math.exp %9 : vector<50x128xf32>
    %cst_7 = arith.constant 1.000000e+00 : f32
    %11 = vector.broadcast %cst_7 : f32 to vector<50x128xf32>
    %12 = arith.subf %10, %11 : vector<50x128xf32>
    %13 = arith.select %7, %5, %12 : vector<50x128xi1>, vector<50x128xf32>
    %c0_8 = arith.constant 0 : index
    %c0_9 = arith.constant 0 : index
    %14 = vector.load %arg4[%c0_8, %c0_9] : memref<128x4xf32, #tpu.memory_space<vmem>>, vector<128x4xf32>
    %cst_10 = arith.constant dense<0.000000e+00> : vector<50x4xf32>
    %15 = tpu.matmul %13, %14, %cst_10 {dimension_numbers = #tpu.dot_dimension_numbers<[1], [0], [0], [1], [0, 0, 1, 1], [], []>} : vector<50x128xf32>, vector<128x4xf32>, vector<50x4xf32> -> vector<50x4xf32>
    %c0_11 = arith.constant 0 : index
    %16 = memref.load %arg5[%c0_11] : memref<1xf32, #tpu.memory_space<smem>>
    %17 = vector.broadcast %16 : f32 to vector<50x4xf32>
    %18 = arith.addf %15, %17 : vector<50x4xf32>
    %c0_12 = arith.constant 0 : index
    %c0_13 = arith.constant 0 : index
    %19 = vector.load %arg6[%c0_12, %c0_13] : memref<50x4xf32, #tpu.memory_space<vmem>>, vector<50x4xf32>
    tpu.vector_store %arg6[%c0_12, %c0_13], %18 {strides = array<i32>} : memref<50x4xf32, #tpu.memory_space<vmem>>, vector<50x4xf32>,
    return
  }
  func.func @transform_0(%arg0: i32) -> (i32, i32) {
    %c0_i32 = arith.constant 0 : i32
    %c0_i32_0 = arith.constant 0 : i32
    return %arg0, %c0_i32 : i32, i32
  }
  func.func @transform_1(%arg0: i32) -> (i32, i32) {
    %c0_i32 = arith.constant 0 : i32
    %c0_i32_0 = arith.constant 0 : i32
    %c0_i32_1 = arith.constant 0 : i32
    return %c0_i32, %c0_i32_0 : i32, i32
  }
  func.func @transform_2(%arg0: i32) -> (i32, i32) {
    %c0_i32 = arith.constant 0 : i32
    %c0_i32_0 = arith.constant 0 : i32
    %c0_i32_1 = arith.constant 0 : i32
    return %c0_i32, %c0_i32_0 : i32, i32
  }
  func.func @transform_3(%arg0: i32) -> (i32, i32) {
    %c0_i32 = arith.constant 0 : i32
    %c0_i32_0 = arith.constant 0 : i32
    %c0_i32_1 = arith.constant 0 : i32
    return %c0_i32, %c0_i32_0 : i32, i32
  }
  func.func @transform_4(%arg0: i32) -> i32 {
    %c0_i32 = arith.constant 0 : i32
    %c0_i32_0 = arith.constant 0 : i32
    return %c0_i32 : i32
  }
  func.func @transform_5(%arg0: i32) -> (i32, i32) {
    %c0_i32 = arith.constant 0 : i32
    %c0_i32_0 = arith.constant 0 : i32
    return %arg0, %c0_i32 : i32, i32
  }
}

</mosaic_0001>

<bundles_post_ra>
// kernel: tpu_custom_call.1
= control target key start
LH: loop header
LB: loop body
LE: loop exit
PB: predicated region body
PF: predicated region fallthrough
CT: control target
= control target key end

     0   :  { %11 = vsyncpa [#allocation4], 0  ;;  %s297_s21 = smov [#allocation3]   ;;  %s298_s23 = smov 128   ;;  %s462_s0 = inlined_call_operand.hbm [shape: f32[50,128], index: 0, kind: input, shape index: {}]   ;;  %s463_s1 = inlined_call_operand.vmem [shape: f32[128,128], index: 1, kind: input, shape index: {}]   ;;  %s464_s2 = inlined_call_operand.vmem [shape: f32[1,128], index: 2, kind: input, shape index: {}]   ;;  %s465_s3 = inlined_call_operand.vmem [shape: f32[128,4], index: 3, kind: input, shape index: {}]   ;;  %s466_s4 = inlined_call_operand.<no memory space> [shape: f32[1], index: 4, kind: input, shape index: {}]   ;;  %s467_s5 = inlined_call_operand.vmem [shape: f32[50,4], index: 5, kind: output, shape index: {}]  }
   0x1   :  { %s16_s20 = sshll.u32 %s462_s0, 4  ;;  %s18_s22 = sshll.u32 %s297_s21, 4  ;;  %s17_s20 = int_to_ptr.hbm [resolvable:$true] %s16_s20  ;;  %s19_s22 = int_to_ptr.vmem [resolvable:$true] %s18_s22 }
   0x2   :  { %s299_s24 = smov 8  }
   0x3   :  { %24 = dma.hbm_to_vmem [thread:$0]  %s17_s20, 896, %s19_s22, [#allocation4], %s298_s23, %s298_s23, %s299_s24  }
   0x4   :  { %295 = dma.done.wait [#allocation4], 896  }
   0x5   :  { %296 = vsyncadd [#allocation4], 4294966400  ;;  %v59_v0 = vld [vmem:[%s463_s1 + $0x78] sm:$0xff]  ;;  %v58_v1 = vld [vmem:[%s463_s1 + $0x70] sm:$0xff]  ;;  %vm200_vm7 = vcmask 31744   ;;  %vm207_vm8 = vcmask 25600  }
   0x6   :  { %64 = vmatpush.msra.mxu0 %v59_v0  ;;  %221 = vmatpush.msra.mxu2 %v59_v0  ;;  %v57_v2 = vld [vmem:[%s463_s1 + $0x68] sm:$0xff]  ;;  %v56_v3 = vld [vmem:[%s463_s1 + $0x60] sm:$0xff]  ;;  %v55_v4 = vld [vmem:[%s463_s1 + $0x58] sm:$0xff] }
   0x7   :  { %v54_v5 = vld [vmem:[%s463_s1 + $0x50] sm:$0xff]  ;;  %v53_v6 = vld [vmem:[%s463_s1 + $0x48] sm:$0xff]  ;;  %v52_v7 = vld [vmem:[%s463_s1 + $0x40] sm:$0xff] }
   0x8   :  { %65 = vmatpush.msra.mxu0 %v58_v1  ;;  %222 = vmatpush.msra.mxu2 %v58_v1  ;;  %v51_v8 = vld [vmem:[%s463_s1 + $0x38] sm:$0xff]  ;;  %v50_v9 = vld [vmem:[%s463_s1 + $0x30] sm:$0xff]  ;;  %v49_v10 = vld [vmem:[%s463_s1 + $0x28] sm:$0xff] }
   0x9   :  { %v48_v11 = vld [vmem:[%s463_s1 + $0x20] sm:$0xff]  ;;  %v47_v12 = vld [vmem:[%s463_s1 + $0x18] sm:$0xff]  ;;  %v46_v13 = vld [vmem:[%s463_s1 + $0x10] sm:$0xff] }
   0xa   :  { %66 = vmatpush.msra.mxu0 %v57_v2  ;;  %223 = vmatpush.msra.mxu2 %v57_v2  ;;  %v159_v14 = vld [vmem:[%s465_s3 + $0x78] sm:$0xff]  ;;  %v158_v15 = vld [vmem:[%s465_s3 + $0x70] sm:$0xff]  ;;  %v45_v16 = vld [vmem:[%s463_s1 + $0x8] sm:$0xff] }
   0xb   :  { %162 = vmatpush.msra.mxu1 %v159_v14  ;;  %237 = vmatpush.msra.mxu3 %v159_v14  ;;  %v157_v17 = vld [vmem:[%s465_s3 + $0x68] sm:$0xff]  ;;  %v44_v18 = vld [vmem:[%s463_s1] sm:$0xff]  ;;  %v40_v20 = vld [vmem:[#allocation3 + $0x18] sm:$0xff] }
   0xc   :  { %67 = vmatpush.msra.mxu0 %v56_v3  ;;  %224 = vmatpush.msra.mxu2 %v56_v3  ;;  %v37_v19 = vld [vmem:[#allocation3] sm:$0xff]  ;;  %v155_v22 = vld [vmem:[%s465_s3 + $0x58] sm:$0xff]  ;;  %v154_v23 = vld [vmem:[%s465_s3 + $0x50] sm:$0xff] }
   0xd   :  { %163 = vmatpush.msra.mxu1 %v158_v15  ;;  %238 = vmatpush.msra.mxu3 %v158_v15  ;;  %v156_v21 = vld [vmem:[%s465_s3 + $0x60] sm:$0xff]  ;;  %v153_v24 = vld [vmem:[%s465_s3 + $0x48] sm:$0xff]  ;;  %v39_v27 = vld [vmem:[#allocation3 + $0x10] sm:$0xff] }
   0xe   :  { %68 = vmatpush.msra.mxu0 %v55_v4  ;;  %225 = vmatpush.msra.mxu2 %v55_v4  ;;  %v38_v25 = vld [vmem:[#allocation3 + $0x8] sm:$0xff]  ;;  %v41_v26 = vld [vmem:[#allocation3 + $0x20] sm:$0xff]  ;;  %v43_v29 = vld [vmem:[#allocation3 + $0x30] sm:$0x3] }
   0xf   :  { %164 = vmatpush.msra.mxu1 %v157_v17  ;;  %239 = vmatpush.msra.mxu3 %v157_v17  ;;  %v42_v28 = vld [vmem:[#allocation3 + $0x28] sm:$0xff]  ;;  %v152_v30 = vld [vmem:[%s465_s3 + $0x40] sm:$0xff]  ;;  %v151_v31 = vld [vmem:[%s465_s3 + $0x38] sm:$0xff] }
  0x10   :  { %69 = vmatpush.msra.mxu0 %v54_v5  ;;  %226 = vmatpush.msra.mxu2 %v54_v5  ;;  %v150_v32 = vld [vmem:[%s465_s3 + $0x30] sm:$0xff]  ;;  %v149_v33 = vld [vmem:[%s465_s3 + $0x28] sm:$0xff]  ;;  %v148_v34 = vld [vmem:[%s465_s3 + $0x20] sm:$0xff] }
  0x11   :  { %165 = vmatpush.msra.mxu1 %v156_v21  ;;  %240 = vmatpush.msra.mxu3 %v156_v21  ;;  %v147_v35 = vld [vmem:[%s465_s3 + $0x18] sm:$0xff]  ;;  %v146_v36 = vld [vmem:[%s465_s3 + $0x10] sm:$0xff]  ;;  %v145_v37 = vld [vmem:[%s465_s3 + $0x8] sm:$0xff] }
  0x12   :  { %70 = vmatpush.msra.mxu0 %v53_v6  ;;  %227 = vmatpush.msra.mxu2 %v53_v6  ;;  %v144_v38 = vld [vmem:[%s465_s3] sm:$0xff] }
  0x13   :  { %166 = vmatpush.msra.mxu1 %v155_v22  ;;  %241 = vmatpush.msra.mxu3 %v155_v22  ;;  %v256_v39 = vld [vmem:[%s464_s2] ss:$0 sm:$0xff] }
  0x14   :  { %71 = vmatpush.msra.mxu0 %v52_v7  ;;  %228 = vmatpush.msra.mxu2 %v52_v7 }
  0x15   :  { %167 = vmatpush.msra.mxu1 %v154_v23  ;;  %242 = vmatpush.msra.mxu3 %v154_v23 }
  0x16   :  { %72 = vmatpush.msra.mxu0 %v51_v8  ;;  %229 = vmatpush.msra.mxu2 %v51_v8 }
  0x17   :  { %168 = vmatpush.msra.mxu1 %v153_v24  ;;  %243 = vmatpush.msra.mxu3 %v153_v24 }
  0x18   :  { %73 = vmatpush.msra.mxu0 %v50_v9  ;;  %230 = vmatpush.msra.mxu2 %v50_v9 }
  0x19   :  { %169 = vmatpush.msra.mxu1 %v152_v30  ;;  %244 = vmatpush.msra.mxu3 %v152_v30 }
  0x1a   :  { %74 = vmatpush.msra.mxu0 %v49_v10  ;;  %231 = vmatpush.msra.mxu2 %v49_v10 }
  0x1b   :  { %170 = vmatpush.msra.mxu1 %v151_v31  ;;  %245 = vmatpush.msra.mxu3 %v151_v31 }
  0x1c   :  { %75 = vmatpush.msra.mxu0 %v48_v11  ;;  %232 = vmatpush.msra.mxu2 %v48_v11 }
  0x1d   :  { %171 = vmatpush.msra.mxu1 %v150_v32  ;;  %246 = vmatpush.msra.mxu3 %v150_v32 }
  0x1e   :  { %76 = vmatpush.msra.mxu0 %v47_v12  ;;  %233 = vmatpush.msra.mxu2 %v47_v12 }
  0x1f   :  { %172 = vmatpush.msra.mxu1 %v149_v33  ;;  %247 = vmatpush.msra.mxu3 %v149_v33 }
  0x20   :  { %77 = vmatpush.msra.mxu0 %v46_v13  ;;  %234 = vmatpush.msra.mxu2 %v46_v13 }
  0x21   :  { %173 = vmatpush.msra.mxu1 %v148_v34  ;;  %248 = vmatpush.msra.mxu3 %v148_v34 }
  0x22   :  { %78 = vmatpush.msra.mxu0 %v45_v16  ;;  %235 = vmatpush.msra.mxu2 %v45_v16 }
  0x23   :  { %174 = vmatpush.msra.mxu1 %v147_v35  ;;  %249 = vmatpush.msra.mxu3 %v147_v35 }
  0x24   :  { %79 = vmatpush.msra.mxu0 %v44_v18  ;;  %236 = vmatpush.msra.mxu2 %v44_v18 }
  0x25   :  { %80 = vmatmul.f32.vlgmr.msra.gmra.mxu0 %v37_v19  ;;  %89 = vmatmul.f32.vlgmr.msra.gmra.mxu2 %v40_v20 }
  0x26   :  { %175 = vmatpush.msra.mxu1 %v146_v36  ;;  %250 = vmatpush.msra.mxu3 %v146_v36 }
  0x28   :  { %176 = vmatpush.msra.mxu1 %v145_v37  ;;  %251 = vmatpush.msra.mxu3 %v145_v37 }
  0x2a   :  { %177 = vmatpush.msra.mxu1 %v144_v38  ;;  %252 = vmatpush.msra.mxu3 %v144_v38 }
  0x2d   :  { %83 = vmatmul.f32.gmra.mxu0 %v38_v25  ;;  %92 = vmatmul.f32.gmra.mxu2 %v41_v26  ;;  %v161_v25 = vstv %s466_s4 }
  0x35   :  { %86 = vmatmul.f32.gmra.mxu0 %v39_v27  ;;  %95 = vmatmul.f32.gmra.mxu2 %v42_v28 }
  0x3d   :  { %98 = vmatmul.f32.gmra.mxu2 %v43_v29 }
  0xa2   :  { %v81_v40 = vpop.f32.mrf.mxu0 }
  0xa3   :  { %v82_v41 = vadd.f32 %v256_v39, %v81_v40 }
  0xa5   :  { %v109_v42 = vmin.f32 %v82_v41, 0.0  ;;  %vm102_vm0 = vcmp.gt.f32.partialorder %v82_v41, 0.0 }
  0xa7   :  { %v116_v43 = vmul.f32 1.442695, %v109_v42 }
  0xa8   :  { %v90_v44 = vpop.f32.mrf.mxu2 }
  0xa9   :  { %257 = vpow2.f32 %v116_v43  ;;  %v91_v52 = vadd.f32 %v256_v39, %v90_v44 }
  0xaa   :  { %v84_v45 = vpop.f32.mrf.mxu0 }
  0xab   :  { %v85_v46 = vadd.f32 %v256_v39, %v84_v45  ;;  %v112_v58 = vmin.f32 %v91_v52, 0.0  ;;  %vm105_vm5 = vcmp.gt.f32.partialorder %v91_v52, 0.0 }
  0xad   :  { %v110_v47 = vmin.f32 %v85_v46, 0.0  ;;  %vm103_vm1 = vcmp.gt.f32.partialorder %v85_v46, 0.0  ;;  %v122_v1 = vmul.f32 1.442695, %v112_v58 }
  0xaf   :  { %v258_v48 = vpop.eup %257  ;;  %v118_v49 = vmul.f32 1.442695, %v110_v47 }
  0xb0   :  { %v93_v50 = vpop.f32.mrf.mxu2  ;;  %v214_v51 = vadd.f32 -1.0, %v258_v48 }
  0xb1   :  { %259 = vpow2.f32 %v118_v49  ;;  %v94_v53 = vadd.f32 %v256_v39, %v93_v50 }
  0xb2   :  { %v87_v54 = vpop.f32.mrf.mxu0  ;;  %v137_v55 = vsel %vm102_vm0, %v82_v41, %v214_v51 }
  0xb3   :  { %v113_v56 = vmin.f32 %v94_v53, 0.0  ;;  %v88_v57 = vadd.f32 %v256_v39, %v87_v54  ;;  %178 = vmatmul.f32.vlgmr.msra.gmra.mxu1 %v137_v55  ;;  %vm106_vm2 = vcmp.gt.f32.partialorder %v94_v53, 0.0 }
  0xb5   :  { %v124_v59 = vmul.f32 1.442695, %v113_v56  ;;  %v111_v60 = vmin.f32 %v88_v57, 0.0  ;;  %vm104_vm3 = vcmp.gt.f32.partialorder %v88_v57, 0.0 }
  0xb7   :  { %v260_v61 = vpop.eup %259  ;;  %261 = vpow2.f32 %v124_v59  ;;  %v120_v62 = vmul.f32 1.442695, %v111_v60 }
  0xb8   :  { %v96_v63 = vpop.f32.mrf.mxu2  ;;  %v215_v0 = vadd.f32 -1.0, %v260_v61 }
  0xb9   :  { %263 = vpow2.f32 %v120_v62  ;;  %v97_v2 = vadd.f32 %v256_v39, %v96_v63 }
  0xba   :  { %v138_v3 = vsel %vm103_vm1, %v85_v46, %v215_v0  ;;  %265 = vpow2.f32 %v122_v1 }
  0xbb   :  { %v114_v4 = vmin.f32 %v97_v2, 0.0  ;;  %181 = vmatmul.f32.gmra.mxu1 %v138_v3  ;;  %vm107_vm4 = vcmp.gt.f32.partialorder %v97_v2, 0.0 }
  0xbd   :  { %v262_v5 = vpop.eup %261  ;;  %v126_v6 = vmul.f32 1.442695, %v114_v4 }
  0xbe   :  { %v218_v7 = vadd.f32 -1.0, %v262_v5 }
  0xbf   :  { %v264_v8 = vpop.eup %263  ;;  %267 = vpow2.f32 %v126_v6 }
  0xc0   :  { %v99_v9 = vpop.f32.mrf.mxu2  ;;  %v141_v10 = vsel %vm106_vm2, %v94_v53, %v218_v7  ;;  %v216_v11 = vadd.f32 -1.0, %v264_v8  ;;  %v266_v14 = vpop.eup %265 }
  0xc1   :  { %v100_v12 = vadd.f32 %v256_v39, %v99_v9  ;;  %190 = vmatmul.f32.vlgmr.msra.gmra.mxu3 %v141_v10  ;;  %v217_v19 = vadd.f32 -1.0, %v266_v14 }
  0xc2   :  { %v139_v13 = vsel %vm104_vm3, %v88_v57, %v216_v11 }
  0xc3   :  { %v115_v15 = vmin.f32 %v100_v12, 0.0  ;;  %184 = vmatmul.f32.gmra.mxu1 %v139_v13  ;;  %v140_v21 = vsel %vm105_vm5, %v91_v52, %v217_v19  ;;  %vm108_vm6 = vcmp.gt.f32.partialorder %v100_v12, 0.0 }
  0xc5   :  { %v268_v16 = vpop.eup %267  ;;  %v128_v17 = vmul.f32 1.442695, %v115_v15 }
  0xc6   :  { %v219_v18 = vadd.f32 -1.0, %v268_v16 }
  0xc7   :  { %269 = vpow2.f32 %v128_v17 }
  0xc8   :  { %v142_v20 = vsel %vm107_vm4, %v97_v2, %v219_v18 }
  0xc9   :  { %193 = vmatmul.f32.gmra.mxu3 %v142_v20 }
  0xcb   :  { %187 = vmatmul.f32.gmra.mxu1 %v140_v21 }
  0xcd   :  { %v270_v22 = vpop.eup %269 }
  0xce   :  { %v220_v23 = vadd.f32 -1.0, %v270_v22 }
  0xd0   :  { %v143_v24 = vsel %vm108_vm6, %v100_v12, %v220_v23 }
  0xd1   :  { %196 = vmatmul.f32.gmra.mxu3 %v143_v24 }
 0x130   :  { %v179_v26 = vpop.f32.mrf.mxu1 }
 0x131   :  { %v180_v27 = vadd.f32 %v179_v26, %v161_v25 }
 0x133   :  { %201 = vst.msk [vmem:[%s467_s5] sm:$0xff] %vm200_vm7, %v180_v27 }
 0x138   :  { %v182_v28 = vpop.f32.mrf.mxu1 }
 0x139   :  { %v183_v29 = vadd.f32 %v182_v28, %v161_v25 }
 0x13b   :  { %202 = vst.msk [vmem:[%s467_s5 + $0x8] sm:$0xff] %vm200_vm7, %v183_v29 }
 0x140   :  { %v185_v30 = vpop.f32.mrf.mxu1 }
 0x141   :  { %v186_v31 = vadd.f32 %v185_v30, %v161_v25 }
 0x143   :  { %203 = vst.msk [vmem:[%s467_s5 + $0x10] sm:$0xff] %vm200_vm7, %v186_v31 }
 0x144   :  { %v191_v32 = vpop.f32.mrf.mxu3 }
 0x145   :  { %v192_v33 = vadd.f32 %v191_v32, %v161_v25 }
 0x147   :  { %205 = vst.msk [vmem:[%s467_s5 + $0x20] sm:$0xff] %vm200_vm7, %v192_v33 }
 0x148   :  { %v188_v34 = vpop.f32.mrf.mxu1 }
 0x149   :  { %v189_v35 = vadd.f32 %v188_v34, %v161_v25 }
 0x14b   :  { %204 = vst.msk [vmem:[%s467_s5 + $0x18] sm:$0xff] %vm200_vm7, %v189_v35 }
 0x14c   :  { %v194_v36 = vpop.f32.mrf.mxu3 }
 0x14d   :  { %v195_v37 = vadd.f32 %v194_v36, %v161_v25 }
 0x14f   :  { %206 = vst.msk [vmem:[%s467_s5 + $0x28] sm:$0xff] %vm200_vm7, %v195_v37 }
 0x154   :  { %v197_v38 = vpop.f32.mrf.mxu3 }
 0x155   :  { %v198_v39 = vadd.f32 %v197_v38, %v161_v25 }
 0x157   :  { %208 = vst.msk [vmem:[%s467_s5 + $0x30] sm:$0x3] %vm207_vm8, %v198_v39 }
 0x158   :  { %213 = vsyncpa [#allocation4], 1 }

</bundles_post_ra>
